<compile_context>
chip_gen: v7x
topology: tpu7x:2x2x1
jax: 0.10.0
libtpu: 0.0.40
codegen_flags: <defaults>
</compile_context>

<pallas_src>
import math

import jax
import jax.numpy as jnp
from jax.experimental import pallas as pl
from jax.experimental.pallas import tpu as pltpu

LOG_2PI = math.log(2.0 * math.pi)
LANES = 128
SUBLANES = 8


def make_pvmm_kernel(M, tile_rows, n_terms):
    """Builds the Pallas kernel body (static sizes closed over)."""

    def kernel(means_ref, biases_ref, scale_ref, u_ref, out_ref):
        pid = pl.program_id(0)
        hs = scale_ref[0]                         # 1/(sigma*sqrt(2)) from SMEM
        u_h = u_ref[...] * hs                     # (tile_rows, 128)

        def term(k):
            z = u_h - means_ref[k]                # means pre-scaled by hs
            return biases_ref[k] - z * z          # == bias - 0.5*((u-I)/sigma)^2

        # ---- flattened logsumexp over all components / MC samples ----------
        # pass 1: running max
        m = term(0)
        for k in range(1, n_terms):
            m = jnp.maximum(m, term(k))
        # pass 2: sum of exps (terms recomputed; cheap VALU filler, keeps the
        # vreg budget low instead of holding n_terms live tiles)
        s = jnp.exp(term(0) - m)
        for k in range(1, n_terms):
            s = s + jnp.exp(term(k) - m)
        logp = jnp.log(s) + m                     # (tile_rows, 128)

        # zero-out padding elements so they contribute 0 to the sum
        row = jax.lax.broadcasted_iota(jnp.int32, (tile_rows, LANES), 0)
        lane = jax.lax.broadcasted_iota(jnp.int32, (tile_rows, LANES), 1)
        idx = (pid * tile_rows + row) * LANES + lane
        logp = jnp.where(idx < M, logp, 0.0)

        # fold to one (8,128) per-lane partial sum; lane-dense unmasked store
        acc = logp[0:SUBLANES, :]
        for g in range(1, tile_rows // SUBLANES):
            acc = acc + logp[g * SUBLANES:(g + 1) * SUBLANES, :]
        out_ref[...] = acc

    return kernel


def pvmm_forward_pallas(u, I, sigma_n, log_w_sm, In, *, tile_rows=1024):
    """Equivalent of PVMM.forward(u, n_MC_components).

    u:        (M,) float32 data
    I:        (n_phases,) component means
    sigma_n:  () std dev
    log_w_sm: (n_phases + n_interfaces,) log softmax weights
    In:       (n_interfaces, n_mc) MC sample means per interface
    """
    M = u.shape[0]
    n_phases = I.shape[0]
    n_interfaces, n_mc = In.shape
    n_terms = n_phases + n_interfaces * n_mc

    # lane+sublane dense layout for the data
    R = pl.cdiv(M, LANES)
    R8 = pl.cdiv(R, SUBLANES) * SUBLANES
    tr = min(tile_rows, R8)
    tr = pl.cdiv(tr, SUBLANES) * SUBLANES
    R_pad = pl.cdiv(R8, tr) * tr
    num_tiles = R_pad // tr

    u_flat = jnp.zeros((R_pad * LANES,), jnp.float32).at[:M].set(u.astype(jnp.float32))
    u2 = u_flat.reshape(R_pad, LANES)

    # scalar parameter precompute (one reciprocal / log total, done in XLA)
    sigma = sigma_n.astype(jnp.float32)
    hs = (1.0 / sigma) * jnp.float32(math.sqrt(0.5))       # (z*hs)^2 == 0.5*(z/sigma)^2
    const = -jnp.log(sigma) - 0.5 * LOG_2PI

    means = jnp.concatenate(
        [I.astype(jnp.float32), In.astype(jnp.float32).reshape(-1)]
    )
    means_h = means * hs                                    # (n_terms,)
    biases = jnp.concatenate(
        [
            log_w_sm[:n_phases].astype(jnp.float32) + const,
            jnp.repeat(log_w_sm[n_phases:].astype(jnp.float32), n_mc)
            + const - math.log(n_mc),
        ]
    )                                                       # (n_terms,)
    scale_arr = jnp.reshape(hs, (1,))

    kernel = make_pvmm_kernel(M, tr, n_terms)

    partials = pl.pallas_call(
        kernel,
        out_shape=jax.ShapeDtypeStruct((num_tiles * SUBLANES, LANES), jnp.float32),
        grid_spec=pltpu.PrefetchScalarGridSpec(
            num_scalar_prefetch=0,
            grid=(num_tiles,),
            in_specs=[
                pl.BlockSpec(memory_space=pltpu.MemorySpace.SMEM),   # means*hs
                pl.BlockSpec(memory_space=pltpu.MemorySpace.SMEM),   # biases
                pl.BlockSpec(memory_space=pltpu.MemorySpace.SMEM),   # hs
                pl.BlockSpec((tr, LANES), lambda i: (i, 0)),         # u tile
            ],
            out_specs=pl.BlockSpec((SUBLANES, LANES), lambda i: (i, 0)),
        ),
        compiler_params=pltpu.CompilerParams(
            dimension_semantics=("parallel",)
        ),
    )(means_h, biases, scale_arr, u2)

    # final reduction + normalization in the wrapper (tiny)
    return -jnp.sum(partials) / M


def pvmm_forward_ref(u, I, sigma_n, log_w_sm, In):
    """Pure-JAX reference mirroring the PyTorch code."""
    const = -jnp.log(sigma_n) - 0.5 * LOG_2PI
    lp_int = const - 0.5 * ((u[None, :] - I[:, None]) / sigma_n) ** 2
    lp_if = []
    n_mc = In.shape[1]
    for c in range(In.shape[0]):
        lp = const - 0.5 * ((u[None, :] - In[c][:, None]) / sigma_n) ** 2
        lp_if.append(jax.scipy.special.logsumexp(lp, axis=0) - math.log(n_mc))
    logp = jnp.concatenate([lp_int, jnp.stack(lp_if, axis=0)], axis=0)
    log_pu = jax.scipy.special.logsumexp(log_w_sm[:, None] + logp, axis=0)
    return -jnp.sum(log_pu) / u.shape[0]


if __name__ == "__main__":
    n_phases = 3
    n_interfaces = (n_phases * (n_phases - 1)) // 2     # comb(n_phases, 2)
    n_mc_components = 8
    M = 1000

    # Deterministic parameter init, matching PVMM.reset_params()
    I = jnp.linspace(0.0, 1.0, n_phases, dtype=jnp.float32)
    sigma_n = jnp.asarray(0.1, jnp.float32)
    W = jnp.zeros((n_interfaces + n_phases,), jnp.float32)
    log_w_sm = jax.nn.log_softmax(W, axis=0)

    # Deterministic inputs / MC samples
    # TODO(synk): MC sampling of uniform eps (torch.distributions.Uniform) is
    # done deterministically here in the host wrapper, not inside the kernel.
    key = jax.random.PRNGKey(0)
    k_u, k_eps = jax.random.split(key)
    u = jax.random.uniform(k_u, (M,), jnp.float32)
    eps = jax.random.uniform(k_eps, (n_interfaces, n_mc_components), jnp.float32)

    # MC sample means per interface (Ia < Ib), same pair order as the torch loops
    pairs = [(i, j) for i in range(n_phases) for j in range(n_phases) if i < j]
    In_rows = []
    for c, (a, b) in enumerate(pairs):
        In_rows.append(eps[c] * (I[b] - I[a]) + I[a])
    In = jnp.stack(In_rows, axis=0)                      # (n_interfaces, n_mc)

    loss = pvmm_forward_pallas(u, I, sigma_n, log_w_sm, In)
    loss = jax.block_until_ready(loss)

    loss_ref = pvmm_forward_ref(u, I, sigma_n, log_w_sm, In)
    assert jnp.allclose(loss, loss_ref, rtol=3e-5, atol=3e-5), (loss, loss_ref)

    print("KERNEL_OK")
</pallas_src>

<mosaic_0001>
module attributes {stable_mosaic.version = 11 : i64} {
  func.func @kernel(%arg0: i32, %arg1: memref<27xf32, #tpu.memory_space<smem>>, %arg2: memref<27xf32, #tpu.memory_space<smem>>, %arg3: memref<1xf32, #tpu.memory_space<smem>>, %arg4: memref<8x128xf32, #tpu.memory_space<vmem>>, %arg5: memref<8x128xf32, #tpu.memory_space<vmem>>) attributes {dimension_semantics = [#tpu.dimension_semantics<parallel>], iteration_bounds = array<i64: 1>, scalar_prefetch = 0 : i64, scratch_operands = 0 : i64, tpu.core_type = #tpu.core_type<tc>, window_params = [{transform_indices = @transform_0, window_bounds = array<i64: 27>}, {transform_indices = @transform_1, window_bounds = array<i64: 27>}, {transform_indices = @transform_2, window_bounds = array<i64: 1>}, {transform_indices = @transform_3, window_bounds = array<i64: 8, 128>}, {transform_indices = @transform_4, window_bounds = array<i64: 8, 128>}]} {
    %c0 = arith.constant 0 : index
    %0 = memref.load %arg3[%c0] : memref<1xf32, #tpu.memory_space<smem>>
    %c0_0 = arith.constant 0 : index
    %c0_1 = arith.constant 0 : index
    %1 = vector.load %arg4[%c0_0, %c0_1] : memref<8x128xf32, #tpu.memory_space<vmem>>, vector<8x128xf32>
    %2 = vector.broadcast %0 : f32 to vector<8x128xf32>
    %3 = arith.mulf %1, %2 : vector<8x128xf32>
    %c0_2 = arith.constant 0 : index
    %4 = memref.load %arg1[%c0_2] : memref<27xf32, #tpu.memory_space<smem>>
    %5 = vector.broadcast %4 : f32 to vector<8x128xf32>
    %6 = arith.subf %3, %5 : vector<8x128xf32>
    %c0_3 = arith.constant 0 : index
    %7 = memref.load %arg2[%c0_3] : memref<27xf32, #tpu.memory_space<smem>>
    %8 = arith.mulf %6, %6 : vector<8x128xf32>
    %9 = vector.broadcast %7 : f32 to vector<8x128xf32>
    %10 = arith.subf %9, %8 : vector<8x128xf32>
    %c1 = arith.constant 1 : index
    %11 = memref.load %arg1[%c1] : memref<27xf32, #tpu.memory_space<smem>>
    %12 = vector.broadcast %11 : f32 to vector<8x128xf32>
    %13 = arith.subf %3, %12 : vector<8x128xf32>
    %c1_4 = arith.constant 1 : index
    %14 = memref.load %arg2[%c1_4] : memref<27xf32, #tpu.memory_space<smem>>
    %15 = arith.mulf %13, %13 : vector<8x128xf32>
    %16 = vector.broadcast %14 : f32 to vector<8x128xf32>
    %17 = arith.subf %16, %15 : vector<8x128xf32>
    %18 = arith.maximumf %10, %17 : vector<8x128xf32>
    %c2 = arith.constant 2 : index
    %19 = memref.load %arg1[%c2] : memref<27xf32, #tpu.memory_space<smem>>
    %20 = vector.broadcast %19 : f32 to vector<8x128xf32>
    %21 = arith.subf %3, %20 : vector<8x128xf32>
    %c2_5 = arith.constant 2 : index
    %22 = memref.load %arg2[%c2_5] : memref<27xf32, #tpu.memory_space<smem>>
    %23 = arith.mulf %21, %21 : vector<8x128xf32>
    %24 = vector.broadcast %22 : f32 to vector<8x128xf32>
    %25 = arith.subf %24, %23 : vector<8x128xf32>
    %26 = arith.maximumf %18, %25 : vector<8x128xf32>
    %c3 = arith.constant 3 : index
    %27 = memref.load %arg1[%c3] : memref<27xf32, #tpu.memory_space<smem>>
    %28 = vector.broadcast %27 : f32 to vector<8x128xf32>
    %29 = arith.subf %3, %28 : vector<8x128xf32>
    %c3_6 = arith.constant 3 : index
    %30 = memref.load %arg2[%c3_6] : memref<27xf32, #tpu.memory_space<smem>>
    %31 = arith.mulf %29, %29 : vector<8x128xf32>
    %32 = vector.broadcast %30 : f32 to vector<8x128xf32>
    %33 = arith.subf %32, %31 : vector<8x128xf32>
    %34 = arith.maximumf %26, %33 : vector<8x128xf32>
    %c4 = arith.constant 4 : index
    %35 = memref.load %arg1[%c4] : memref<27xf32, #tpu.memory_space<smem>>
    %36 = vector.broadcast %35 : f32 to vector<8x128xf32>
    %37 = arith.subf %3, %36 : vector<8x128xf32>
    %c4_7 = arith.constant 4 : index
    %38 = memref.load %arg2[%c4_7] : memref<27xf32, #tpu.memory_space<smem>>
    %39 = arith.mulf %37, %37 : vector<8x128xf32>
    %40 = vector.broadcast %38 : f32 to vector<8x128xf32>
    %41 = arith.subf %40, %39 : vector<8x128xf32>
    %42 = arith.maximumf %34, %41 : vector<8x128xf32>
    %c5 = arith.constant 5 : index
    %43 = memref.load %arg1[%c5] : memref<27xf32, #tpu.memory_space<smem>>
    %44 = vector.broadcast %43 : f32 to vector<8x128xf32>
    %45 = arith.subf %3, %44 : vector<8x128xf32>
    %c5_8 = arith.constant 5 : index
    %46 = memref.load %arg2[%c5_8] : memref<27xf32, #tpu.memory_space<smem>>
    %47 = arith.mulf %45, %45 : vector<8x128xf32>
    %48 = vector.broadcast %46 : f32 to vector<8x128xf32>
    %49 = arith.subf %48, %47 : vector<8x128xf32>
    %50 = arith.maximumf %42, %49 : vector<8x128xf32>
    %c6 = arith.constant 6 : index
    %51 = memref.load %arg1[%c6] : memref<27xf32, #tpu.memory_space<smem>>
    %52 = vector.broadcast %51 : f32 to vector<8x128xf32>
    %53 = arith.subf %3, %52 : vector<8x128xf32>
    %c6_9 = arith.constant 6 : index
    %54 = memref.load %arg2[%c6_9] : memref<27xf32, #tpu.memory_space<smem>>
    %55 = arith.mulf %53, %53 : vector<8x128xf32>
    %56 = vector.broadcast %54 : f32 to vector<8x128xf32>
    %57 = arith.subf %56, %55 : vector<8x128xf32>
    %58 = arith.maximumf %50, %57 : vector<8x128xf32>
    %c7 = arith.constant 7 : index
    %59 = memref.load %arg1[%c7] : memref<27xf32, #tpu.memory_space<smem>>
    %60 = vector.broadcast %59 : f32 to vector<8x128xf32>
    %61 = arith.subf %3, %60 : vector<8x128xf32>
    %c7_10 = arith.constant 7 : index
    %62 = memref.load %arg2[%c7_10] : memref<27xf32, #tpu.memory_space<smem>>
    %63 = arith.mulf %61, %61 : vector<8x128xf32>
    %64 = vector.broadcast %62 : f32 to vector<8x128xf32>
    %65 = arith.subf %64, %63 : vector<8x128xf32>
    %66 = arith.maximumf %58, %65 : vector<8x128xf32>
    %c8 = arith.constant 8 : index
    %67 = memref.load %arg1[%c8] : memref<27xf32, #tpu.memory_space<smem>>
    %68 = vector.broadcast %67 : f32 to vector<8x128xf32>
    %69 = arith.subf %3, %68 : vector<8x128xf32>
    %c8_11 = arith.constant 8 : index
    %70 = memref.load %arg2[%c8_11] : memref<27xf32, #tpu.memory_space<smem>>
    %71 = arith.mulf %69, %69 : vector<8x128xf32>
    %72 = vector.broadcast %70 : f32 to vector<8x128xf32>
    %73 = arith.subf %72, %71 : vector<8x128xf32>
    %74 = arith.maximumf %66, %73 : vector<8x128xf32>
    %c9 = arith.constant 9 : index
    %75 = memref.load %arg1[%c9] : memref<27xf32, #tpu.memory_space<smem>>
    %76 = vector.broadcast %75 : f32 to vector<8x128xf32>
    %77 = arith.subf %3, %76 : vector<8x128xf32>
    %c9_12 = arith.constant 9 : index
    %78 = memref.load %arg2[%c9_12] : memref<27xf32, #tpu.memory_space<smem>>
    %79 = arith.mulf %77, %77 : vector<8x128xf32>
    %80 = vector.broadcast %78 : f32 to vector<8x128xf32>
    %81 = arith.subf %80, %79 : vector<8x128xf32>
    %82 = arith.maximumf %74, %81 : vector<8x128xf32>
    %c10 = arith.constant 10 : index
    %83 = memref.load %arg1[%c10] : memref<27xf32, #tpu.memory_space<smem>>
    %84 = vector.broadcast %83 : f32 to vector<8x128xf32>
    %85 = arith.subf %3, %84 : vector<8x128xf32>
    %c10_13 = arith.constant 10 : index
    %86 = memref.load %arg2[%c10_13] : memref<27xf32, #tpu.memory_space<smem>>
    %87 = arith.mulf %85, %85 : vector<8x128xf32>
    %88 = vector.broadcast %86 : f32 to vector<8x128xf32>
    %89 = arith.subf %88, %87 : vector<8x128xf32>
    %90 = arith.maximumf %82, %89 : vector<8x128xf32>
    %c11 = arith.constant 11 : index
    %91 = memref.load %arg1[%c11] : memref<27xf32, #tpu.memory_space<smem>>
    %92 = vector.broadcast %91 : f32 to vector<8x128xf32>
    %93 = arith.subf %3, %92 : vector<8x128xf32>
    %c11_14 = arith.constant 11 : index
    %94 = memref.load %arg2[%c11_14] : memref<27xf32, #tpu.memory_space<smem>>
    %95 = arith.mulf %93, %93 : vector<8x128xf32>
    %96 = vector.broadcast %94 : f32 to vector<8x128xf32>
    %97 = arith.subf %96, %95 : vector<8x128xf32>
    %98 = arith.maximumf %90, %97 : vector<8x128xf32>
    %c12 = arith.constant 12 : index
    %99 = memref.load %arg1[%c12] : memref<27xf32, #tpu.memory_space<smem>>
    %100 = vector.broadcast %99 : f32 to vector<8x128xf32>
    %101 = arith.subf %3, %100 : vector<8x128xf32>
    %c12_15 = arith.constant 12 : index
    %102 = memref.load %arg2[%c12_15] : memref<27xf32, #tpu.memory_space<smem>>
    %103 = arith.mulf %101, %101 : vector<8x128xf32>
    %104 = vector.broadcast %102 : f32 to vector<8x128xf32>
    %105 = arith.subf %104, %103 : vector<8x128xf32>
    %106 = arith.maximumf %98, %105 : vector<8x128xf32>
    %c13 = arith.constant 13 : index
    %107 = memref.load %arg1[%c13] : memref<27xf32, #tpu.memory_space<smem>>
    %108 = vector.broadcast %107 : f32 to vector<8x128xf32>
    %109 = arith.subf %3, %108 : vector<8x128xf32>
    %c13_16 = arith.constant 13 : index
    %110 = memref.load %arg2[%c13_16] : memref<27xf32, #tpu.memory_space<smem>>
    %111 = arith.mulf %109, %109 : vector<8x128xf32>
    %112 = vector.broadcast %110 : f32 to vector<8x128xf32>
    %113 = arith.subf %112, %111 : vector<8x128xf32>
    %114 = arith.maximumf %106, %113 : vector<8x128xf32>
    %c14 = arith.constant 14 : index
    %115 = memref.load %arg1[%c14] : memref<27xf32, #tpu.memory_space<smem>>
    %116 = vector.broadcast %115 : f32 to vector<8x128xf32>
    %117 = arith.subf %3, %116 : vector<8x128xf32>
    %c14_17 = arith.constant 14 : index
    %118 = memref.load %arg2[%c14_17] : memref<27xf32, #tpu.memory_space<smem>>
    %119 = arith.mulf %117, %117 : vector<8x128xf32>
    %120 = vector.broadcast %118 : f32 to vector<8x128xf32>
    %121 = arith.subf %120, %119 : vector<8x128xf32>
    %122 = arith.maximumf %114, %121 : vector<8x128xf32>
    %c15 = arith.constant 15 : index
    %123 = memref.load %arg1[%c15] : memref<27xf32, #tpu.memory_space<smem>>
    %124 = vector.broadcast %123 : f32 to vector<8x128xf32>
    %125 = arith.subf %3, %124 : vector<8x128xf32>
    %c15_18 = arith.constant 15 : index
    %126 = memref.load %arg2[%c15_18] : memref<27xf32, #tpu.memory_space<smem>>
    %127 = arith.mulf %125, %125 : vector<8x128xf32>
    %128 = vector.broadcast %126 : f32 to vector<8x128xf32>
    %129 = arith.subf %128, %127 : vector<8x128xf32>
    %130 = arith.maximumf %122, %129 : vector<8x128xf32>
    %c16 = arith.constant 16 : index
    %131 = memref.load %arg1[%c16] : memref<27xf32, #tpu.memory_space<smem>>
    %132 = vector.broadcast %131 : f32 to vector<8x128xf32>
    %133 = arith.subf %3, %132 : vector<8x128xf32>
    %c16_19 = arith.constant 16 : index
    %134 = memref.load %arg2[%c16_19] : memref<27xf32, #tpu.memory_space<smem>>
    %135 = arith.mulf %133, %133 : vector<8x128xf32>
    %136 = vector.broadcast %134 : f32 to vector<8x128xf32>
    %137 = arith.subf %136, %135 : vector<8x128xf32>
    %138 = arith.maximumf %130, %137 : vector<8x128xf32>
    %c17 = arith.constant 17 : index
    %139 = memref.load %arg1[%c17] : memref<27xf32, #tpu.memory_space<smem>>
    %140 = vector.broadcast %139 : f32 to vector<8x128xf32>
    %141 = arith.subf %3, %140 : vector<8x128xf32>
    %c17_20 = arith.constant 17 : index
    %142 = memref.load %arg2[%c17_20] : memref<27xf32, #tpu.memory_space<smem>>
    %143 = arith.mulf %141, %141 : vector<8x128xf32>
    %144 = vector.broadcast %142 : f32 to vector<8x128xf32>
    %145 = arith.subf %144, %143 : vector<8x128xf32>
    %146 = arith.maximumf %138, %145 : vector<8x128xf32>
    %c18 = arith.constant 18 : index
    %147 = memref.load %arg1[%c18] : memref<27xf32, #tpu.memory_space<smem>>
    %148 = vector.broadcast %147 : f32 to vector<8x128xf32>
    %149 = arith.subf %3, %148 : vector<8x128xf32>
    %c18_21 = arith.constant 18 : index
    %150 = memref.load %arg2[%c18_21] : memref<27xf32, #tpu.memory_space<smem>>
    %151 = arith.mulf %149, %149 : vector<8x128xf32>
    %152 = vector.broadcast %150 : f32 to vector<8x128xf32>
    %153 = arith.subf %152, %151 : vector<8x128xf32>
    %154 = arith.maximumf %146, %153 : vector<8x128xf32>
    %c19 = arith.constant 19 : index
    %155 = memref.load %arg1[%c19] : memref<27xf32, #tpu.memory_space<smem>>
    %156 = vector.broadcast %155 : f32 to vector<8x128xf32>
    %157 = arith.subf %3, %156 : vector<8x128xf32>
    %c19_22 = arith.constant 19 : index
    %158 = memref.load %arg2[%c19_22] : memref<27xf32, #tpu.memory_space<smem>>
    %159 = arith.mulf %157, %157 : vector<8x128xf32>
    %160 = vector.broadcast %158 : f32 to vector<8x128xf32>
    %161 = arith.subf %160, %159 : vector<8x128xf32>
    %162 = arith.maximumf %154, %161 : vector<8x128xf32>
    %c20 = arith.constant 20 : index
    %163 = memref.load %arg1[%c20] : memref<27xf32, #tpu.memory_space<smem>>
    %164 = vector.broadcast %163 : f32 to vector<8x128xf32>
    %165 = arith.subf %3, %164 : vector<8x128xf32>
    %c20_23 = arith.constant 20 : index
    %166 = memref.load %arg2[%c20_23] : memref<27xf32, #tpu.memory_space<smem>>
    %167 = arith.mulf %165, %165 : vector<8x128xf32>
    %168 = vector.broadcast %166 : f32 to vector<8x128xf32>
    %169 = arith.subf %168, %167 : vector<8x128xf32>
    %170 = arith.maximumf %162, %169 : vector<8x128xf32>
    %c21 = arith.constant 21 : index
    %171 = memref.load %arg1[%c21] : memref<27xf32, #tpu.memory_space<smem>>
    %172 = vector.broadcast %171 : f32 to vector<8x128xf32>
    %173 = arith.subf %3, %172 : vector<8x128xf32>
    %c21_24 = arith.constant 21 : index
    %174 = memref.load %arg2[%c21_24] : memref<27xf32, #tpu.memory_space<smem>>
    %175 = arith.mulf %173, %173 : vector<8x128xf32>
    %176 = vector.broadcast %174 : f32 to vector<8x128xf32>
    %177 = arith.subf %176, %175 : vector<8x128xf32>
    %178 = arith.maximumf %170, %177 : vector<8x128xf32>
    %c22 = arith.constant 22 : index
    %179 = memref.load %arg1[%c22] : memref<27xf32, #tpu.memory_space<smem>>
    %180 = vector.broadcast %179 : f32 to vector<8x128xf32>
    %181 = arith.subf %3, %180 : vector<8x128xf32>
    %c22_25 = arith.constant 22 : index
    %182 = memref.load %arg2[%c22_25] : memref<27xf32, #tpu.memory_space<smem>>
    %183 = arith.mulf %181, %181 : vector<8x128xf32>
    %184 = vector.broadcast %182 : f32 to vector<8x128xf32>
    %185 = arith.subf %184, %183 : vector<8x128xf32>
    %186 = arith.maximumf %178, %185 : vector<8x128xf32>
    %c23 = arith.constant 23 : index
    %187 = memref.load %arg1[%c23] : memref<27xf32, #tpu.memory_space<smem>>
    %188 = vector.broadcast %187 : f32 to vector<8x128xf32>
    %189 = arith.subf %3, %188 : vector<8x128xf32>
    %c23_26 = arith.constant 23 : index
    %190 = memref.load %arg2[%c23_26] : memref<27xf32, #tpu.memory_space<smem>>
    %191 = arith.mulf %189, %189 : vector<8x128xf32>
    %192 = vector.broadcast %190 : f32 to vector<8x128xf32>
    %193 = arith.subf %192, %191 : vector<8x128xf32>
    %194 = arith.maximumf %186, %193 : vector<8x128xf32>
    %c24 = arith.constant 24 : index
    %195 = memref.load %arg1[%c24] : memref<27xf32, #tpu.memory_space<smem>>
    %196 = vector.broadcast %195 : f32 to vector<8x128xf32>
    %197 = arith.subf %3, %196 : vector<8x128xf32>
    %c24_27 = arith.constant 24 : index
    %198 = memref.load %arg2[%c24_27] : memref<27xf32, #tpu.memory_space<smem>>
    %199 = arith.mulf %197, %197 : vector<8x128xf32>
    %200 = vector.broadcast %198 : f32 to vector<8x128xf32>
    %201 = arith.subf %200, %199 : vector<8x128xf32>
    %202 = arith.maximumf %194, %201 : vector<8x128xf32>
    %c25 = arith.constant 25 : index
    %203 = memref.load %arg1[%c25] : memref<27xf32, #tpu.memory_space<smem>>
    %204 = vector.broadcast %203 : f32 to vector<8x128xf32>
    %205 = arith.subf %3, %204 : vector<8x128xf32>
    %c25_28 = arith.constant 25 : index
    %206 = memref.load %arg2[%c25_28] : memref<27xf32, #tpu.memory_space<smem>>
    %207 = arith.mulf %205, %205 : vector<8x128xf32>
    %208 = vector.broadcast %206 : f32 to vector<8x128xf32>
    %209 = arith.subf %208, %207 : vector<8x128xf32>
    %210 = arith.maximumf %202, %209 : vector<8x128xf32>
    %c26 = arith.constant 26 : index
    %211 = memref.load %arg1[%c26] : memref<27xf32, #tpu.memory_space<smem>>
    %212 = vector.broadcast %211 : f32 to vector<8x128xf32>
    %213 = arith.subf %3, %212 : vector<8x128xf32>
    %c26_29 = arith.constant 26 : index
    %214 = memref.load %arg2[%c26_29] : memref<27xf32, #tpu.memory_space<smem>>
    %215 = arith.mulf %213, %213 : vector<8x128xf32>
    %216 = vector.broadcast %214 : f32 to vector<8x128xf32>
    %217 = arith.subf %216, %215 : vector<8x128xf32>
    %218 = arith.maximumf %210, %217 : vector<8x128xf32>
    %c0_30 = arith.constant 0 : index
    %219 = memref.load %arg1[%c0_30] : memref<27xf32, #tpu.memory_space<smem>>
    %220 = vector.broadcast %219 : f32 to vector<8x128xf32>
    %221 = arith.subf %3, %220 : vector<8x128xf32>
    %c0_31 = arith.constant 0 : index
    %222 = memref.load %arg2[%c0_31] : memref<27xf32, #tpu.memory_space<smem>>
    %223 = arith.mulf %221, %221 : vector<8x128xf32>
    %224 = vector.broadcast %222 : f32 to vector<8x128xf32>
    %225 = arith.subf %224, %223 : vector<8x128xf32>
    %226 = arith.subf %225, %218 : vector<8x128xf32>
    %227 = math.exp %226 : vector<8x128xf32>
    %c1_32 = arith.constant 1 : index
    %228 = memref.load %arg1[%c1_32] : memref<27xf32, #tpu.memory_space<smem>>
    %229 = vector.broadcast %228 : f32 to vector<8x128xf32>
    %230 = arith.subf %3, %229 : vector<8x128xf32>
    %c1_33 = arith.constant 1 : index
    %231 = memref.load %arg2[%c1_33] : memref<27xf32, #tpu.memory_space<smem>>
    %232 = arith.mulf %230, %230 : vector<8x128xf32>
    %233 = vector.broadcast %231 : f32 to vector<8x128xf32>
    %234 = arith.subf %233, %232 : vector<8x128xf32>
    %235 = arith.subf %234, %218 : vector<8x128xf32>
    %236 = math.exp %235 : vector<8x128xf32>
    %237 = arith.addf %227, %236 : vector<8x128xf32>
    %c2_34 = arith.constant 2 : index
    %238 = memref.load %arg1[%c2_34] : memref<27xf32, #tpu.memory_space<smem>>
    %239 = vector.broadcast %238 : f32 to vector<8x128xf32>
    %240 = arith.subf %3, %239 : vector<8x128xf32>
    %c2_35 = arith.constant 2 : index
    %241 = memref.load %arg2[%c2_35] : memref<27xf32, #tpu.memory_space<smem>>
    %242 = arith.mulf %240, %240 : vector<8x128xf32>
    %243 = vector.broadcast %241 : f32 to vector<8x128xf32>
    %244 = arith.subf %243, %242 : vector<8x128xf32>
    %245 = arith.subf %244, %218 : vector<8x128xf32>
    %246 = math.exp %245 : vector<8x128xf32>
    %247 = arith.addf %237, %246 : vector<8x128xf32>
    %c3_36 = arith.constant 3 : index
    %248 = memref.load %arg1[%c3_36] : memref<27xf32, #tpu.memory_space<smem>>
    %249 = vector.broadcast %248 : f32 to vector<8x128xf32>
    %250 = arith.subf %3, %249 : vector<8x128xf32>
    %c3_37 = arith.constant 3 : index
    %251 = memref.load %arg2[%c3_37] : memref<27xf32, #tpu.memory_space<smem>>
    %252 = arith.mulf %250, %250 : vector<8x128xf32>
    %253 = vector.broadcast %251 : f32 to vector<8x128xf32>
    %254 = arith.subf %253, %252 : vector<8x128xf32>
    %255 = arith.subf %254, %218 : vector<8x128xf32>
    %256 = math.exp %255 : vector<8x128xf32>
    %257 = arith.addf %247, %256 : vector<8x128xf32>
    %c4_38 = arith.constant 4 : index
    %258 = memref.load %arg1[%c4_38] : memref<27xf32, #tpu.memory_space<smem>>
    %259 = vector.broadcast %258 : f32 to vector<8x128xf32>
    %260 = arith.subf %3, %259 : vector<8x128xf32>
    %c4_39 = arith.constant 4 : index
    %261 = memref.load %arg2[%c4_39] : memref<27xf32, #tpu.memory_space<smem>>
    %262 = arith.mulf %260, %260 : vector<8x128xf32>
    %263 = vector.broadcast %261 : f32 to vector<8x128xf32>
    %264 = arith.subf %263, %262 : vector<8x128xf32>
    %265 = arith.subf %264, %218 : vector<8x128xf32>
    %266 = math.exp %265 : vector<8x128xf32>
    %267 = arith.addf %257, %266 : vector<8x128xf32>
    %c5_40 = arith.constant 5 : index
    %268 = memref.load %arg1[%c5_40] : memref<27xf32, #tpu.memory_space<smem>>
    %269 = vector.broadcast %268 : f32 to vector<8x128xf32>
    %270 = arith.subf %3, %269 : vector<8x128xf32>
    %c5_41 = arith.constant 5 : index
    %271 = memref.load %arg2[%c5_41] : memref<27xf32, #tpu.memory_space<smem>>
    %272 = arith.mulf %270, %270 : vector<8x128xf32>
    %273 = vector.broadcast %271 : f32 to vector<8x128xf32>
    %274 = arith.subf %273, %272 : vector<8x128xf32>
    %275 = arith.subf %274, %218 : vector<8x128xf32>
    %276 = math.exp %275 : vector<8x128xf32>
    %277 = arith.addf %267, %276 : vector<8x128xf32>
    %c6_42 = arith.constant 6 : index
    %278 = memref.load %arg1[%c6_42] : memref<27xf32, #tpu.memory_space<smem>>
    %279 = vector.broadcast %278 : f32 to vector<8x128xf32>
    %280 = arith.subf %3, %279 : vector<8x128xf32>
    %c6_43 = arith.constant 6 : index
    %281 = memref.load %arg2[%c6_43] : memref<27xf32, #tpu.memory_space<smem>>
    %282 = arith.mulf %280, %280 : vector<8x128xf32>
    %283 = vector.broadcast %281 : f32 to vector<8x128xf32>
    %284 = arith.subf %283, %282 : vector<8x128xf32>
    %285 = arith.subf %284, %218 : vector<8x128xf32>
    %286 = math.exp %285 : vector<8x128xf32>
    %287 = arith.addf %277, %286 : vector<8x128xf32>
    %c7_44 = arith.constant 7 : index
    %288 = memref.load %arg1[%c7_44] : memref<27xf32, #tpu.memory_space<smem>>
    %289 = vector.broadcast %288 : f32 to vector<8x128xf32>
    %290 = arith.subf %3, %289 : vector<8x128xf32>
    %c7_45 = arith.constant 7 : index
    %291 = memref.load %arg2[%c7_45] : memref<27xf32, #tpu.memory_space<smem>>
    %292 = arith.mulf %290, %290 : vector<8x128xf32>
    %293 = vector.broadcast %291 : f32 to vector<8x128xf32>
    %294 = arith.subf %293, %292 : vector<8x128xf32>
    %295 = arith.subf %294, %218 : vector<8x128xf32>
    %296 = math.exp %295 : vector<8x128xf32>
    %297 = arith.addf %287, %296 : vector<8x128xf32>
    %c8_46 = arith.constant 8 : index
    %298 = memref.load %arg1[%c8_46] : memref<27xf32, #tpu.memory_space<smem>>
    %299 = vector.broadcast %298 : f32 to vector<8x128xf32>
    %300 = arith.subf %3, %299 : vector<8x128xf32>
    %c8_47 = arith.constant 8 : index
    %301 = memref.load %arg2[%c8_47] : memref<27xf32, #tpu.memory_space<smem>>
    %302 = arith.mulf %300, %300 : vector<8x128xf32>
    %303 = vector.broadcast %301 : f32 to vector<8x128xf32>
    %304 = arith.subf %303, %302 : vector<8x128xf32>
    %305 = arith.subf %304, %218 : vector<8x128xf32>
    %306 = math.exp %305 : vector<8x128xf32>
    %307 = arith.addf %297, %306 : vector<8x128xf32>
    %c9_48 = arith.constant 9 : index
    %308 = memref.load %arg1[%c9_48] : memref<27xf32, #tpu.memory_space<smem>>
    %309 = vector.broadcast %308 : f32 to vector<8x128xf32>
    %310 = arith.subf %3, %309 : vector<8x128xf32>
    %c9_49 = arith.constant 9 : index
    %311 = memref.load %arg2[%c9_49] : memref<27xf32, #tpu.memory_space<smem>>
    %312 = arith.mulf %310, %310 : vector<8x128xf32>
    %313 = vector.broadcast %311 : f32 to vector<8x128xf32>
    %314 = arith.subf %313, %312 : vector<8x128xf32>
    %315 = arith.subf %314, %218 : vector<8x128xf32>
    %316 = math.exp %315 : vector<8x128xf32>
    %317 = arith.addf %307, %316 : vector<8x128xf32>
    %c10_50 = arith.constant 10 : index
    %318 = memref.load %arg1[%c10_50] : memref<27xf32, #tpu.memory_space<smem>>
    %319 = vector.broadcast %318 : f32 to vector<8x128xf32>
    %320 = arith.subf %3, %319 : vector<8x128xf32>
    %c10_51 = arith.constant 10 : index
    %321 = memref.load %arg2[%c10_51] : memref<27xf32, #tpu.memory_space<smem>>
    %322 = arith.mulf %320, %320 : vector<8x128xf32>
    %323 = vector.broadcast %321 : f32 to vector<8x128xf32>
    %324 = arith.subf %323, %322 : vector<8x128xf32>
    %325 = arith.subf %324, %218 : vector<8x128xf32>
    %326 = math.exp %325 : vector<8x128xf32>
    %327 = arith.addf %317, %326 : vector<8x128xf32>
    %c11_52 = arith.constant 11 : index
    %328 = memref.load %arg1[%c11_52] : memref<27xf32, #tpu.memory_space<smem>>
    %329 = vector.broadcast %328 : f32 to vector<8x128xf32>
    %330 = arith.subf %3, %329 : vector<8x128xf32>
    %c11_53 = arith.constant 11 : index
    %331 = memref.load %arg2[%c11_53] : memref<27xf32, #tpu.memory_space<smem>>
    %332 = arith.mulf %330, %330 : vector<8x128xf32>
    %333 = vector.broadcast %331 : f32 to vector<8x128xf32>
    %334 = arith.subf %333, %332 : vector<8x128xf32>
    %335 = arith.subf %334, %218 : vector<8x128xf32>
    %336 = math.exp %335 : vector<8x128xf32>
    %337 = arith.addf %327, %336 : vector<8x128xf32>
    %c12_54 = arith.constant 12 : index
    %338 = memref.load %arg1[%c12_54] : memref<27xf32, #tpu.memory_space<smem>>
    %339 = vector.broadcast %338 : f32 to vector<8x128xf32>
    %340 = arith.subf %3, %339 : vector<8x128xf32>
    %c12_55 = arith.constant 12 : index
    %341 = memref.load %arg2[%c12_55] : memref<27xf32, #tpu.memory_space<smem>>
    %342 = arith.mulf %340, %340 : vector<8x128xf32>
    %343 = vector.broadcast %341 : f32 to vector<8x128xf32>
    %344 = arith.subf %343, %342 : vector<8x128xf32>
    %345 = arith.subf %344, %218 : vector<8x128xf32>
    %346 = math.exp %345 : vector<8x128xf32>
    %347 = arith.addf %337, %346 : vector<8x128xf32>
    %c13_56 = arith.constant 13 : index
    %348 = memref.load %arg1[%c13_56] : memref<27xf32, #tpu.memory_space<smem>>
    %349 = vector.broadcast %348 : f32 to vector<8x128xf32>
    %350 = arith.subf %3, %349 : vector<8x128xf32>
    %c13_57 = arith.constant 13 : index
    %351 = memref.load %arg2[%c13_57] : memref<27xf32, #tpu.memory_space<smem>>
    %352 = arith.mulf %350, %350 : vector<8x128xf32>
    %353 = vector.broadcast %351 : f32 to vector<8x128xf32>
    %354 = arith.subf %353, %352 : vector<8x128xf32>
    %355 = arith.subf %354, %218 : vector<8x128xf32>
    %356 = math.exp %355 : vector<8x128xf32>
    %357 = arith.addf %347, %356 : vector<8x128xf32>
    %c14_58 = arith.constant 14 : index
    %358 = memref.load %arg1[%c14_58] : memref<27xf32, #tpu.memory_space<smem>>
    %359 = vector.broadcast %358 : f32 to vector<8x128xf32>
    %360 = arith.subf %3, %359 : vector<8x128xf32>
    %c14_59 = arith.constant 14 : index
    %361 = memref.load %arg2[%c14_59] : memref<27xf32, #tpu.memory_space<smem>>
    %362 = arith.mulf %360, %360 : vector<8x128xf32>
    %363 = vector.broadcast %361 : f32 to vector<8x128xf32>
    %364 = arith.subf %363, %362 : vector<8x128xf32>
    %365 = arith.subf %364, %218 : vector<8x128xf32>
    %366 = math.exp %365 : vector<8x128xf32>
    %367 = arith.addf %357, %366 : vector<8x128xf32>
    %c15_60 = arith.constant 15 : index
    %368 = memref.load %arg1[%c15_60] : memref<27xf32, #tpu.memory_space<smem>>
    %369 = vector.broadcast %368 : f32 to vector<8x128xf32>
    %370 = arith.subf %3, %369 : vector<8x128xf32>
    %c15_61 = arith.constant 15 : index
    %371 = memref.load %arg2[%c15_61] : memref<27xf32, #tpu.memory_space<smem>>
    %372 = arith.mulf %370, %370 : vector<8x128xf32>
    %373 = vector.broadcast %371 : f32 to vector<8x128xf32>
    %374 = arith.subf %373, %372 : vector<8x128xf32>
    %375 = arith.subf %374, %218 : vector<8x128xf32>
    %376 = math.exp %375 : vector<8x128xf32>
    %377 = arith.addf %367, %376 : vector<8x128xf32>
    %c16_62 = arith.constant 16 : index
    %378 = memref.load %arg1[%c16_62] : memref<27xf32, #tpu.memory_space<smem>>
    %379 = vector.broadcast %378 : f32 to vector<8x128xf32>
    %380 = arith.subf %3, %379 : vector<8x128xf32>
    %c16_63 = arith.constant 16 : index
    %381 = memref.load %arg2[%c16_63] : memref<27xf32, #tpu.memory_space<smem>>
    %382 = arith.mulf %380, %380 : vector<8x128xf32>
    %383 = vector.broadcast %381 : f32 to vector<8x128xf32>
    %384 = arith.subf %383, %382 : vector<8x128xf32>
    %385 = arith.subf %384, %218 : vector<8x128xf32>
    %386 = math.exp %385 : vector<8x128xf32>
    %387 = arith.addf %377, %386 : vector<8x128xf32>
    %c17_64 = arith.constant 17 : index
    %388 = memref.load %arg1[%c17_64] : memref<27xf32, #tpu.memory_space<smem>>
    %389 = vector.broadcast %388 : f32 to vector<8x128xf32>
    %390 = arith.subf %3, %389 : vector<8x128xf32>
    %c17_65 = arith.constant 17 : index
    %391 = memref.load %arg2[%c17_65] : memref<27xf32, #tpu.memory_space<smem>>
    %392 = arith.mulf %390, %390 : vector<8x128xf32>
    %393 = vector.broadcast %391 : f32 to vector<8x128xf32>
    %394 = arith.subf %393, %392 : vector<8x128xf32>
    %395 = arith.subf %394, %218 : vector<8x128xf32>
    %396 = math.exp %395 : vector<8x128xf32>
    %397 = arith.addf %387, %396 : vector<8x128xf32>
    %c18_66 = arith.constant 18 : index
    %398 = memref.load %arg1[%c18_66] : memref<27xf32, #tpu.memory_space<smem>>
    %399 = vector.broadcast %398 : f32 to vector<8x128xf32>
    %400 = arith.subf %3, %399 : vector<8x128xf32>
    %c18_67 = arith.constant 18 : index
    %401 = memref.load %arg2[%c18_67] : memref<27xf32, #tpu.memory_space<smem>>
    %402 = arith.mulf %400, %400 : vector<8x128xf32>
    %403 = vector.broadcast %401 : f32 to vector<8x128xf32>
    %404 = arith.subf %403, %402 : vector<8x128xf32>
    %405 = arith.subf %404, %218 : vector<8x128xf32>
    %406 = math.exp %405 : vector<8x128xf32>
    %407 = arith.addf %397, %406 : vector<8x128xf32>
    %c19_68 = arith.constant 19 : index
    %408 = memref.load %arg1[%c19_68] : memref<27xf32, #tpu.memory_space<smem>>
    %409 = vector.broadcast %408 : f32 to vector<8x128xf32>
    %410 = arith.subf %3, %409 : vector<8x128xf32>
    %c19_69 = arith.constant 19 : index
    %411 = memref.load %arg2[%c19_69] : memref<27xf32, #tpu.memory_space<smem>>
    %412 = arith.mulf %410, %410 : vector<8x128xf32>
    %413 = vector.broadcast %411 : f32 to vector<8x128xf32>
    %414 = arith.subf %413, %412 : vector<8x128xf32>
    %415 = arith.subf %414, %218 : vector<8x128xf32>
    %416 = math.exp %415 : vector<8x128xf32>
    %417 = arith.addf %407, %416 : vector<8x128xf32>
    %c20_70 = arith.constant 20 : index
    %418 = memref.load %arg1[%c20_70] : memref<27xf32, #tpu.memory_space<smem>>
    %419 = vector.broadcast %418 : f32 to vector<8x128xf32>
    %420 = arith.subf %3, %419 : vector<8x128xf32>
    %c20_71 = arith.constant 20 : index
    %421 = memref.load %arg2[%c20_71] : memref<27xf32, #tpu.memory_space<smem>>
    %422 = arith.mulf %420, %420 : vector<8x128xf32>
    %423 = vector.broadcast %421 : f32 to vector<8x128xf32>
    %424 = arith.subf %423, %422 : vector<8x128xf32>
    %425 = arith.subf %424, %218 : vector<8x128xf32>
    %426 = math.exp %425 : vector<8x128xf32>
    %427 = arith.addf %417, %426 : vector<8x128xf32>
    %c21_72 = arith.constant 21 : index
    %428 = memref.load %arg1[%c21_72] : memref<27xf32, #tpu.memory_space<smem>>
    %429 = vector.broadcast %428 : f32 to vector<8x128xf32>
    %430 = arith.subf %3, %429 : vector<8x128xf32>
    %c21_73 = arith.constant 21 : index
    %431 = memref.load %arg2[%c21_73] : memref<27xf32, #tpu.memory_space<smem>>
    %432 = arith.mulf %430, %430 : vector<8x128xf32>
    %433 = vector.broadcast %431 : f32 to vector<8x128xf32>
    %434 = arith.subf %433, %432 : vector<8x128xf32>
    %435 = arith.subf %434, %218 : vector<8x128xf32>
    %436 = math.exp %435 : vector<8x128xf32>
    %437 = arith.addf %427, %436 : vector<8x128xf32>
    %c22_74 = arith.constant 22 : index
    %438 = memref.load %arg1[%c22_74] : memref<27xf32, #tpu.memory_space<smem>>
    %439 = vector.broadcast %438 : f32 to vector<8x128xf32>
    %440 = arith.subf %3, %439 : vector<8x128xf32>
    %c22_75 = arith.constant 22 : index
    %441 = memref.load %arg2[%c22_75] : memref<27xf32, #tpu.memory_space<smem>>
    %442 = arith.mulf %440, %440 : vector<8x128xf32>
    %443 = vector.broadcast %441 : f32 to vector<8x128xf32>
    %444 = arith.subf %443, %442 : vector<8x128xf32>
    %445 = arith.subf %444, %218 : vector<8x128xf32>
    %446 = math.exp %445 : vector<8x128xf32>
    %447 = arith.addf %437, %446 : vector<8x128xf32>
    %c23_76 = arith.constant 23 : index
    %448 = memref.load %arg1[%c23_76] : memref<27xf32, #tpu.memory_space<smem>>
    %449 = vector.broadcast %448 : f32 to vector<8x128xf32>
    %450 = arith.subf %3, %449 : vector<8x128xf32>
    %c23_77 = arith.constant 23 : index
    %451 = memref.load %arg2[%c23_77] : memref<27xf32, #tpu.memory_space<smem>>
    %452 = arith.mulf %450, %450 : vector<8x128xf32>
    %453 = vector.broadcast %451 : f32 to vector<8x128xf32>
    %454 = arith.subf %453, %452 : vector<8x128xf32>
    %455 = arith.subf %454, %218 : vector<8x128xf32>
    %456 = math.exp %455 : vector<8x128xf32>
    %457 = arith.addf %447, %456 : vector<8x128xf32>
    %c24_78 = arith.constant 24 : index
    %458 = memref.load %arg1[%c24_78] : memref<27xf32, #tpu.memory_space<smem>>
    %459 = vector.broadcast %458 : f32 to vector<8x128xf32>
    %460 = arith.subf %3, %459 : vector<8x128xf32>
    %c24_79 = arith.constant 24 : index
    %461 = memref.load %arg2[%c24_79] : memref<27xf32, #tpu.memory_space<smem>>
    %462 = arith.mulf %460, %460 : vector<8x128xf32>
    %463 = vector.broadcast %461 : f32 to vector<8x128xf32>
    %464 = arith.subf %463, %462 : vector<8x128xf32>
    %465 = arith.subf %464, %218 : vector<8x128xf32>
    %466 = math.exp %465 : vector<8x128xf32>
    %467 = arith.addf %457, %466 : vector<8x128xf32>
    %c25_80 = arith.constant 25 : index
    %468 = memref.load %arg1[%c25_80] : memref<27xf32, #tpu.memory_space<smem>>
    %469 = vector.broadcast %468 : f32 to vector<8x128xf32>
    %470 = arith.subf %3, %469 : vector<8x128xf32>
    %c25_81 = arith.constant 25 : index
    %471 = memref.load %arg2[%c25_81] : memref<27xf32, #tpu.memory_space<smem>>
    %472 = arith.mulf %470, %470 : vector<8x128xf32>
    %473 = vector.broadcast %471 : f32 to vector<8x128xf32>
    %474 = arith.subf %473, %472 : vector<8x128xf32>
    %475 = arith.subf %474, %218 : vector<8x128xf32>
    %476 = math.exp %475 : vector<8x128xf32>
    %477 = arith.addf %467, %476 : vector<8x128xf32>
    %c26_82 = arith.constant 26 : index
    %478 = memref.load %arg1[%c26_82] : memref<27xf32, #tpu.memory_space<smem>>
    %479 = vector.broadcast %478 : f32 to vector<8x128xf32>
    %480 = arith.subf %3, %479 : vector<8x128xf32>
    %c26_83 = arith.constant 26 : index
    %481 = memref.load %arg2[%c26_83] : memref<27xf32, #tpu.memory_space<smem>>
    %482 = arith.mulf %480, %480 : vector<8x128xf32>
    %483 = vector.broadcast %481 : f32 to vector<8x128xf32>
    %484 = arith.subf %483, %482 : vector<8x128xf32>
    %485 = arith.subf %484, %218 : vector<8x128xf32>
    %486 = math.exp %485 : vector<8x128xf32>
    %487 = arith.addf %477, %486 : vector<8x128xf32>
    %488 = math.log %487 : vector<8x128xf32>
    %489 = arith.addf %488, %218 : vector<8x128xf32>
    %490 = tpu.iota {dimensions = array<i32: 0>} : vector<8x128xi32>
    %491 = tpu.iota {dimensions = array<i32: 1>} : vector<8x128xi32>
    %c8_i32 = arith.constant 8 : i32
    %492 = arith.muli %arg0, %c8_i32 : i32
    %493 = vector.broadcast %492 : i32 to vector<8x128xi32>
    %494 = arith.addi %493, %490 : vector<8x128xi32>
    %c128_i32 = arith.constant 128 : i32
    %495 = vector.broadcast %c128_i32 : i32 to vector<8x128xi32>
    %496 = arith.muli %494, %495 : vector<8x128xi32>
    %497 = arith.addi %496, %491 : vector<8x128xi32>
    %c1000_i32 = arith.constant 1000 : i32
    %498 = vector.broadcast %c1000_i32 : i32 to vector<8x128xi32>
    %499 = arith.cmpi slt, %497, %498 : vector<8x128xi32>
    %cst = arith.constant 0.000000e+00 : f32
    %500 = vector.broadcast %cst : f32 to vector<8x128xf32>
    %501 = arith.select %499, %489, %500 : vector<8x128xi1>, vector<8x128xf32>
    %c0_84 = arith.constant 0 : index
    %c0_85 = arith.constant 0 : index
    %502 = vector.load %arg5[%c0_84, %c0_85] : memref<8x128xf32, #tpu.memory_space<vmem>>, vector<8x128xf32>
    tpu.vector_store %arg5[%c0_84, %c0_85], %501 {strides = array<i32>} : memref<8x128xf32, #tpu.memory_space<vmem>>, vector<8x128xf32>,
    return
  }
  func.func @transform_0(%arg0: i32) -> i32 {
    %c0_i32 = arith.constant 0 : i32
    %c0_i32_0 = arith.constant 0 : i32
    return %c0_i32 : i32
  }
  func.func @transform_1(%arg0: i32) -> i32 {
    %c0_i32 = arith.constant 0 : i32
    %c0_i32_0 = arith.constant 0 : i32
    return %c0_i32 : i32
  }
  func.func @transform_2(%arg0: i32) -> i32 {
    %c0_i32 = arith.constant 0 : i32
    %c0_i32_0 = arith.constant 0 : i32
    return %c0_i32 : i32
  }
  func.func @transform_3(%arg0: i32) -> (i32, i32) {
    %c0_i32 = arith.constant 0 : i32
    %c0_i32_0 = arith.constant 0 : i32
    return %arg0, %c0_i32 : i32, i32
  }
  func.func @transform_4(%arg0: i32) -> (i32, i32) {
    %c0_i32 = arith.constant 0 : i32
    %c0_i32_0 = arith.constant 0 : i32
    return %arg0, %c0_i32 : i32, i32
  }
}

</mosaic_0001>

<bundles_post_ra>
// kernel: tpu_custom_call.1
= control target key start
LH: loop header
LB: loop body
LE: loop exit
PB: predicated region body
PF: predicated region fallthrough
CT: control target
= control target key end

     0   :  { %10 = vsyncpa [#allocation5], 0  ;;  %s921_s0 = inlined_call_operand.vmem [shape: f32[27], index: 0, kind: input, shape index: {}]   ;;  %s922_s1 = inlined_call_operand.vmem [shape: f32[27], index: 1, kind: input, shape index: {}]   ;;  %s923_s2 = inlined_call_operand.<no memory space> [shape: f32[1], index: 2, kind: input, shape index: {}]   ;;  %s924_s3 = inlined_call_operand.vmem [shape: f32[8,128], index: 3, kind: input, shape index: {}]   ;;  %s925_s4 = inlined_call_operand.hbm [shape: f32[8,128], index: 4, kind: output, shape index: {}]  }
   0x1   :  { %11 = vsyncpa [#allocation7], 0 }
   0x2   :  { %12 = vsyncpa [#allocation4], 0  ;;  %s19_s17 = sshll.u32 %s921_s0, 4  ;;  %s29_s20 = sshll.u32 %s922_s1, 4  ;;  %s20_s17 = int_to_ptr.vmem [resolvable:$true] %s19_s17  ;;  %s30_s20 = int_to_ptr.vmem [resolvable:$true] %s29_s20 }
   0x3   :  { %s512_s21 = scalar_lea.vmem %s20_s17, 16  ;;  %p517_p1 = scmp.lt.s32.totalorder %s20_s17, %s20_s17 }
   0x4   :  { %p513_p0 = scmp.ne.s32.totalorder %s20_s17, %s512_s21  ;;  %p518_p2 = scmp.lt.s32.totalorder %s512_s21, %s512_s21 }
   0x6   :  { %p519_p3 = por %p518_p2, %p517_p1 }
   0x8   :  { %p520_p4 = pnand %p519_p3, %p513_p0 }
   0xa   :  { %523 = shalt.err (!%p520_p4)
}
   0xb   :  { %s564_s22 = smov [#allocation3]   ;;  %s524_s23 = scalar_lea.vmem %s30_s20, 16 }
   0xc   :  { %22 = dma.vmem_to_smem %s20_s17, 16, %s564_s22, [#allocation5]  }
   0xd   :  { %p525_p5 = scmp.ne.s32.totalorder %s30_s20, %s524_s23  ;;  %p529_p6 = scmp.lt.s32.totalorder %s30_s20, %s30_s20 }
   0xe   :  { %p530_p7 = scmp.lt.s32.totalorder %s524_s23, %s524_s23 }
  0x10   :  { %p531_p8 = por %p530_p7, %p529_p6 }
  0x12   :  { %p532_p9 = pnand %p531_p8, %p525_p5 }
  0x14   :  { %535 = shalt.err (!%p532_p9)
}
  0x15   :  { %s565_s0 = smov [#allocation6]  }
  0x16   :  { %32 = dma.vmem_to_smem %s30_s20, 16, %s565_s0, [#allocation7]  }
  0x17   :  { %558 = dma.done.wait [#allocation5], 16  }
  0x18   :  { %559 = vsyncadd [#allocation5], 4294967280 }
  0x19   :  { %560 = dma.done.wait [#allocation7], 16  }
  0x1a   :  { %561 = vsyncadd [#allocation7], 4294967280 }
  0x1b   :  { %43 = sfence }
  0x1c   :  { %v45_v0 = vld [vmem:[%s924_s3] sm:$0xff]  ;;  %v46_v1 = vstv %s923_s2  ;;  %s48_s27 = sld [smem:[#allocation3]]  ;;  %s401_s29 = sld [smem:[#allocation3 + $0x1]] }
  0x1d   :  { %s604_s28 = sld [smem:[#allocation6]]  ;;  %s606_s30 = sld [smem:[#allocation6 + $0x1]]  ;;  %v610_v2 = vmul.f32 %v46_v1, %v45_v0 }
  0x1e   :  { %s403_s5 = sld [smem:[#allocation3 + $0x2]]  ;;  %s405_s7 = sld [smem:[#allocation3 + $0x3]] }
  0x1f   :  { %s608_s6 = sld [smem:[#allocation6 + $0x2]]  ;;  %s612_s8 = sld [smem:[#allocation6 + $0x3]] }
  0x20   :  { %s407_s3 = sld [smem:[#allocation3 + $0x4]]  ;;  %s616_s2 = sld [smem:[#allocation3 + $0x5]] }
  0x21   :  { %s614_s9 = sld [smem:[#allocation6 + $0x4]]  ;;  %s618_s10 = sld [smem:[#allocation3 + $0x6]] }
  0x22   :  { %v49_v3 = vstv %s48_s27  ;;  %v56_v5 = vstv %s401_s29  ;;  %s621_s11 = sld [smem:[#allocation6 + $0x5]]  ;;  %s623_s12 = sld [smem:[#allocation3 + $0x7]] }
  0x23   :  { %v50_v4 = vsub.f32 %v610_v2, %v49_v3  ;;  %v53_v6 = vstv %s604_s28  ;;  %v57_v7 = vsub.f32 %v610_v2, %v56_v5  ;;  %v60_v8 = vstv %s606_s30  ;;  %s628_s13 = sld [smem:[#allocation3 + $0x8]]  ;;  %s632_s14 = sld [smem:[#allocation6 + $0x6]] }
  0x24   :  { %v64_v9 = vstv %s403_s5  ;;  %v72_v13 = vstv %s405_s7  ;;  %s634_s15 = sld [smem:[#allocation3 + $0x9]]  ;;  %s638_s16 = sld [smem:[#allocation6 + $0x7]] }
  0x25   :  { %v52_v10 = vmul.f32 %v50_v4, %v50_v4  ;;  %v65_v11 = vsub.f32 %v610_v2, %v64_v9  ;;  %v68_v12 = vstv %s608_s6  ;;  %v59_v14 = vmul.f32 %v57_v7, %v57_v7  ;;  %s644_s17 = sld [smem:[#allocation3 + $0xa]]  ;;  %s646_s18 = sld [smem:[#allocation3 + $0xb]] }
  0x26   :  { %v73_v15 = vsub.f32 %v610_v2, %v72_v13  ;;  %v76_v16 = vstv %s612_s8  ;;  %v80_v17 = vstv %s407_s3  ;;  %v88_v21 = vstv %s616_s2  ;;  %s655_s19 = sld [smem:[#allocation6 + $0x8]]  ;;  %s657_s20 = sld [smem:[#allocation3 + $0xc]] }
  0x27   :  { %v640_v18 = vsub.f32 %v53_v6, %v52_v10  ;;  %v67_v19 = vmul.f32 %v65_v11, %v65_v11  ;;  %v81_v20 = vsub.f32 %v610_v2, %v80_v17  ;;  %v648_v22 = vsub.f32 %v60_v8, %v59_v14  ;;  %s667_s21 = sld [smem:[#allocation6 + $0x9]]  ;;  %s669_s22 = sld [smem:[#allocation3 + $0xd]] }
  0x28   :  { %v75_v23 = vmul.f32 %v73_v15, %v73_v15  ;;  %v89_v24 = vsub.f32 %v610_v2, %v88_v21  ;;  %v84_v27 = vstv %s614_s9  ;;  %v96_v28 = vstv %s618_s10  ;;  %s678_s23 = sld [smem:[#allocation6 + $0xa]]  ;;  %s680_s0 = sld [smem:[#allocation3 + $0xe]] }
  0x29   :  { %v651_v25 = vsub.f32 %v68_v12, %v67_v19  ;;  %v83_v26 = vmul.f32 %v81_v20, %v81_v20  ;;  %v62_v29 = vmax.f32 %v640_v18, %v648_v22  ;;  %v97_v32 = vsub.f32 %v610_v2, %v96_v28  ;;  %s689_s1 = sld [smem:[#allocation6 + $0xb]]  ;;  %s691_s24 = sld [smem:[#allocation3 + $0xf]] }
  0x2a   :  { %v661_v30 = vsub.f32 %v76_v16, %v75_v23  ;;  %v91_v31 = vmul.f32 %v89_v24, %v89_v24  ;;  %v92_v33 = vstv %s621_s11  ;;  %v104_v34 = vstv %s623_s12  ;;  %s699_s25 = sld [smem:[#allocation6 + $0xc]]  ;;  %s701_s26 = sld [smem:[#allocation3 + $0x10]] }
  0x2b   :  { %v112_v35 = vstv %s628_s13  ;;  %v70_v36 = vmax.f32 %v62_v29, %v651_v25  ;;  %v672_v37 = vsub.f32 %v84_v27, %v83_v26  ;;  %v99_v38 = vmul.f32 %v97_v32, %v97_v32  ;;  %s709_s27 = sld [smem:[#allocation6 + $0xd]]  ;;  %s711_s28 = sld [smem:[#allocation3 + $0x11]] }
  0x2c   :  { %v105_v39 = vsub.f32 %v610_v2, %v104_v34  ;;  %v100_v40 = vstv %s632_s14  ;;  %v113_v41 = vsub.f32 %v610_v2, %v112_v35  ;;  %v120_v42 = vstv %s634_s15  ;;  %s719_s29 = sld [smem:[#allocation6 + $0xe]]  ;;  %s721_s30 = sld [smem:[#allocation3 + $0x12]] }
  0x2d   :  { %v78_v43 = vmax.f32 %v70_v36, %v661_v30  ;;  %v683_v44 = vsub.f32 %v92_v33, %v91_v31  ;;  %v121_v46 = vsub.f32 %v610_v2, %v120_v42  ;;  %v108_v47 = vstv %s638_s16  ;;  %s729_s5 = sld [smem:[#allocation6 + $0xf]]  ;;  %s731_s6 = sld [smem:[#allocation3 + $0x13]] }
  0x2e   :  { %v107_v45 = vmul.f32 %v105_v39, %v105_v39  ;;  %v128_v48 = vstv %s644_s17  ;;  %v136_v49 = vstv %s646_s18  ;;  %v694_v51 = vsub.f32 %v100_v40, %v99_v38  ;;  %s739_s7 = sld [smem:[#allocation6 + $0x10]]  ;;  %s741_s8 = sld [smem:[#allocation3 + $0x14]] }
  0x2f   :  { %v86_v50 = vmax.f32 %v78_v43, %v672_v37  ;;  %v115_v52 = vmul.f32 %v113_v41, %v113_v41  ;;  %v129_v53 = vsub.f32 %v610_v2, %v128_v48  ;;  %v116_v54 = vstv %s655_s19  ;;  %s749_s3 = sld [smem:[#allocation6 + $0x11]]  ;;  %s751_s9 = sld [smem:[#allocation3 + $0x15]] }
  0x30   :  { %v144_v55 = vstv %s657_s20  ;;  %v704_v57 = vsub.f32 %v108_v47, %v107_v45  ;;  %v123_v58 = vmul.f32 %v121_v46, %v121_v46  ;;  %v137_v59 = vsub.f32 %v610_v2, %v136_v49  ;;  %s759_s2 = sld [smem:[#allocation6 + $0x12]]  ;;  %s761_s10 = sld [smem:[#allocation3 + $0x16]] }
  0x31   :  { %v94_v56 = vmax.f32 %v86_v50, %v683_v44  ;;  %v124_v60 = vstv %s667_s21  ;;  %v152_v61 = vstv %s669_s22  ;;  %v714_v63 = vsub.f32 %v116_v54, %v115_v52  ;;  %s769_s11 = sld [smem:[#allocation6 + $0x13]]  ;;  %s771_s12 = sld [smem:[#allocation3 + $0x17]] }
  0x32   :  { %v131_v0 = vmul.f32 %v129_v53, %v129_v53  ;;  %v145_v1 = vsub.f32 %v610_v2, %v144_v55  ;;  %v132_v3 = vstv %s678_s23  ;;  %v160_v4 = vstv %s680_s0  ;;  %s779_s13 = sld [smem:[#allocation6 + $0x14]]  ;;  %s781_s14 = sld [smem:[#allocation3 + $0x18]] }
  0x33   :  { %v102_v62 = vmax.f32 %v94_v56, %v694_v51  ;;  %v724_v6 = vsub.f32 %v124_v60, %v123_v58  ;;  %v139_v7 = vmul.f32 %v137_v59, %v137_v59  ;;  %v153_v8 = vsub.f32 %v610_v2, %v152_v61  ;;  %s789_s15 = sld [smem:[#allocation6 + $0x15]]  ;;  %s791_s16 = sld [smem:[#allocation3 + $0x19]] }
  0x34   :  { %v140_v9 = vstv %s689_s1  ;;  %v168_v10 = vstv %s691_s24  ;;  %v734_v12 = vsub.f32 %v132_v3, %v131_v0  ;;  %v147_v13 = vmul.f32 %v145_v1, %v145_v1  ;;  %s799_s17 = sld [smem:[#allocation6 + $0x16]]  ;;  %s801_s18 = sld [smem:[#allocation3 + $0x1a]] }
  0x35   :  { %v110_v5 = vmax.f32 %v102_v62, %v704_v57  ;;  %v161_v14 = vsub.f32 %v610_v2, %v160_v4  ;;  %v148_v15 = vstv %s699_s25  ;;  %v176_v16 = vstv %s701_s26  ;;  %s809_s19 = sld [smem:[#allocation6 + $0x17]]  ;;  %s448_s20 = sld [smem:[#allocation6 + $0x18]] }
  0x36   :  { %v744_v19 = vsub.f32 %v140_v9, %v139_v7  ;;  %v155_v20 = vmul.f32 %v153_v8, %v153_v8  ;;  %v169_v21 = vsub.f32 %v610_v2, %v168_v10  ;;  %v156_v23 = vstv %s709_s27  ;;  %s450_s21 = sld [smem:[#allocation6 + $0x19]]  ;;  %s452_s22 = sld [smem:[#allocation6 + $0x1a]] }
  0x37   :  { %v118_v11 = vmax.f32 %v110_v5, %v714_v63  ;;  %v184_v24 = vstv %s711_s28  ;;  %v754_v27 = vsub.f32 %v148_v15, %v147_v13  ;;  %v163_v28 = vmul.f32 %v161_v14, %v161_v14  ;;  %s566_s23 = smov [#allocation8]  }
  0x38   :  { %v177_v29 = vsub.f32 %v610_v2, %v176_v16  ;;  %v164_v31 = vstv %s719_s29  ;;  %v192_v32 = vstv %s721_s30  ;;  %v764_v34 = vsub.f32 %v156_v23, %v155_v20  ;;  %s391_s0 = sshll.u32 %s566_s23, 4  ;;  %s392_s0 = int_to_ptr.vmem [resolvable:$true] %s391_s0 }
  0x39   :  { %v126_v17 = vmax.f32 %v118_v11, %v724_v6  ;;  %v171_v35 = vmul.f32 %v169_v21, %v169_v21  ;;  %v185_v36 = vsub.f32 %v610_v2, %v184_v24  ;;  %v172_v38 = vstv %s729_s5  ;;  %s536_s1 = scalar_lea.vmem %s392_s0, 128  ;;  %p541_p11 = scmp.lt.s32.totalorder %s392_s0, %s392_s0 }
  0x3a   :  { %v200_v39 = vstv %s731_s6  ;;  %v774_v41 = vsub.f32 %v164_v31, %v163_v28  ;;  %v179_v42 = vmul.f32 %v177_v29, %v177_v29  ;;  %v193_v43 = vsub.f32 %v610_v2, %v192_v32  ;;  %p537_p10 = scmp.ne.s32.totalorder %s392_s0, %s536_s1  ;;  %p542_p12 = scmp.lt.s32.totalorder %s536_s1, %s536_s1 }
  0x3b   :  { %v134_v26 = vmax.f32 %v126_v17, %v734_v12  ;;  %v180_v45 = vstv %s739_s7  ;;  %v208_v46 = vstv %s741_s8  ;;  %v784_v48 = vsub.f32 %v172_v38, %v171_v35 }
  0x3c   :  { %v187_v49 = vmul.f32 %v185_v36, %v185_v36  ;;  %v201_v50 = vsub.f32 %v610_v2, %v200_v39  ;;  %v188_v52 = vstv %s749_s3  ;;  %v216_v53 = vstv %s751_s9  ;;  %p543_p13 = por %p542_p12, %p541_p11 }
  0x3d   :  { %v142_v33 = vmax.f32 %v134_v26, %v744_v19  ;;  %v794_v55 = vsub.f32 %v180_v45, %v179_v42  ;;  %v195_v56 = vmul.f32 %v193_v43, %v193_v43  ;;  %v209_v58 = vsub.f32 %v610_v2, %v208_v46 }
  0x3e   :  { %v196_v59 = vstv %s759_s2  ;;  %v224_v60 = vstv %s761_s10  ;;  %v804_v62 = vsub.f32 %v188_v52, %v187_v49  ;;  %v203_v0 = vmul.f32 %v201_v50, %v201_v50  ;;  %p544_p0 = pnand %p543_p13, %p537_p10 }
  0x3f   :  { %v150_v40 = vmax.f32 %v142_v33, %v754_v27  ;;  %v217_v1 = vsub.f32 %v610_v2, %v216_v53  ;;  %v204_v3 = vstv %s769_s11  ;;  %v232_v4 = vstv %s771_s12 }
  0x40   :  { %v812_v7 = vsub.f32 %v196_v59, %v195_v56  ;;  %v211_v8 = vmul.f32 %v209_v58, %v209_v58  ;;  %v225_v9 = vsub.f32 %v610_v2, %v224_v60  ;;  %v212_v10 = vstv %s779_s13 }
  0x41   :  { %v158_v47 = vmax.f32 %v150_v40, %v764_v34  ;;  %v240_v11 = vstv %s781_s14  ;;  %v818_v14 = vsub.f32 %v204_v3, %v203_v0  ;;  %v219_v15 = vmul.f32 %v217_v1, %v217_v1 }
  0x42   :  { %v233_v16 = vsub.f32 %v610_v2, %v232_v4  ;;  %v220_v17 = vstv %s789_s15  ;;  %v248_v20 = vstv %s791_s16  ;;  %v824_v23 = vsub.f32 %v212_v10, %v211_v8 }
  0x43   :  { %v166_v54 = vmax.f32 %v158_v47, %v774_v41  ;;  %v227_v24 = vmul.f32 %v225_v9, %v225_v9  ;;  %v241_v26 = vsub.f32 %v610_v2, %v240_v11  ;;  %v228_v28 = vstv %s799_s17 }
  0x44   :  { %v256_v29 = vstv %s801_s18  ;;  %v830_v32 = vsub.f32 %v220_v17, %v219_v15  ;;  %v235_v33 = vmul.f32 %v233_v16, %v233_v16  ;;  %v249_v35 = vsub.f32 %v610_v2, %v248_v20 }
  0x45   :  { %v174_v61 = vmax.f32 %v166_v54, %v784_v48  ;;  %v236_v36 = vstv %s809_s19  ;;  %v835_v39 = vsub.f32 %v228_v28, %v227_v24  ;;  %v243_v40 = vmul.f32 %v241_v26, %v241_v26 }
  0x46   :  { %v257_v42 = vsub.f32 %v610_v2, %v256_v29  ;;  %v244_v43 = vstv %s448_s20  ;;  %v839_v46 = vsub.f32 %v236_v36, %v235_v33  ;;  %v251_v47 = vmul.f32 %v249_v35, %v249_v35 }
  0x47   :  { %v182_v5 = vmax.f32 %v174_v61, %v794_v55  ;;  %v252_v49 = vstv %s450_s21  ;;  %v842_v52 = vsub.f32 %v244_v43, %v243_v40  ;;  %v260_v54 = vstv %s452_s22 }
  0x48   :  { %v259_v53 = vmul.f32 %v257_v42, %v257_v42  ;;  %v845_v58 = vsub.f32 %v252_v49, %v251_v47 }
  0x49   :  { %v190_v13 = vmax.f32 %v182_v5, %v804_v62 }
  0x4a   :  { %v848_v2 = vsub.f32 %v260_v54, %v259_v53 }
  0x4b   :  { %v198_v21 = vmax.f32 %v190_v13, %v812_v7 }
  0x4d   :  { %v206_v31 = vmax.f32 %v198_v21, %v818_v14 }
  0x4f   :  { %v214_v38 = vmax.f32 %v206_v31, %v824_v23 }
  0x51   :  { %v222_v45 = vmax.f32 %v214_v38, %v830_v32 }
  0x53   :  { %v230_v50 = vmax.f32 %v222_v45, %v835_v39 }
  0x55   :  { %v238_v56 = vmax.f32 %v230_v50, %v839_v46 }
  0x57   :  { %v246_v59 = vmax.f32 %v238_v56, %v842_v52 }
  0x59   :  { %v254_v60 = vmax.f32 %v246_v59, %v845_v58 }
  0x5b   :  { %v852_v61 = vmax.f32 %v254_v60, %v848_v2 }
  0x5d   :  { %v263_v0 = vsub.f32 %v640_v18, %v852_v61  ;;  %v266_v1 = vsub.f32 %v648_v22, %v852_v61  ;;  %v270_v3 = vsub.f32 %v651_v25, %v852_v61  ;;  %v274_v4 = vsub.f32 %v661_v30, %v852_v61 }
  0x5e   :  { %v278_v5 = vsub.f32 %v672_v37, %v852_v61  ;;  %v282_v13 = vsub.f32 %v683_v44, %v852_v61  ;;  %v286_v22 = vsub.f32 %v694_v51, %v852_v61  ;;  %v290_v30 = vsub.f32 %v704_v57, %v852_v61 }
  0x5f   :  { %v264_v8 = vmul.f32 1.442695, %v263_v0  ;;  %v267_v9 = vmul.f32 1.442695, %v266_v1  ;;  %v271_v10 = vmul.f32 1.442695, %v270_v3  ;;  %v294_v15 = vsub.f32 %v714_v63, %v852_v61 }
  0x60   :  { %v275_v11 = vmul.f32 1.442695, %v274_v4  ;;  %v279_v18 = vmul.f32 1.442695, %v278_v5  ;;  %v283_v25 = vmul.f32 1.442695, %v282_v13  ;;  %v298_v44 = vsub.f32 %v724_v6, %v852_v61 }
  0x61   :  { %456 = vpow2.f32 %v264_v8  ;;  %v287_v37 = vmul.f32 1.442695, %v286_v22  ;;  %v291_v16 = vmul.f32 1.442695, %v290_v30  ;;  %v295_v17 = vmul.f32 1.442695, %v294_v15 }
  0x62   :  { %458 = vpow2.f32 %v267_v9  ;;  %v302_v51 = vsub.f32 %v734_v12, %v852_v61  ;;  %v299_v24 = vmul.f32 1.442695, %v298_v44  ;;  %v306_v57 = vsub.f32 %v744_v19, %v852_v61 }
  0x63   :  { %460 = vpow2.f32 %v271_v10  ;;  %v310_v6 = vsub.f32 %v754_v27, %v852_v61  ;;  %v314_v12 = vsub.f32 %v764_v34, %v852_v61  ;;  %v318_v19 = vsub.f32 %v774_v41, %v852_v61 }
  0x64   :  { %462 = vpow2.f32 %v275_v11  ;;  %v303_v29 = vmul.f32 1.442695, %v302_v51  ;;  %v307_v35 = vmul.f32 1.442695, %v306_v57  ;;  %v322_v27 = vsub.f32 %v784_v48, %v852_v61 }
  0x65   :  { %464 = vpow2.f32 %v279_v18  ;;  %v311_v40 = vmul.f32 1.442695, %v310_v6  ;;  %v315_v45 = vmul.f32 1.442695, %v314_v12  ;;  %v319_v50 = vmul.f32 1.442695, %v318_v19 }
  0x66   :  { %466 = vpow2.f32 %v283_v25  ;;  %v326_v34 = vsub.f32 %v794_v55, %v852_v61  ;;  %v323_v56 = vmul.f32 1.442695, %v322_v27  ;;  %v330_v41 = vsub.f32 %v804_v62, %v852_v61 }
  0x67   :  { %468 = vpow2.f32 %v287_v37  ;;  %v334_v48 = vsub.f32 %v812_v7, %v852_v61  ;;  %v338_v55 = vsub.f32 %v818_v14, %v852_v61  ;;  %v342_v62 = vsub.f32 %v824_v23, %v852_v61 }
  0x68   :  { %470 = vpow2.f32 %v291_v16  ;;  %v327_v0 = vmul.f32 1.442695, %v326_v34  ;;  %v331_v4 = vmul.f32 1.442695, %v330_v41  ;;  %v346_v7 = vsub.f32 %v830_v32, %v852_v61 }
  0x69   :  { %472 = vpow2.f32 %v295_v17  ;;  %v335_v9 = vmul.f32 1.442695, %v334_v48  ;;  %v339_v13 = vmul.f32 1.442695, %v338_v55  ;;  %v343_v25 = vmul.f32 1.442695, %v342_v62 }
  0x6a   :  { %474 = vpow2.f32 %v299_v24  ;;  %v350_v14 = vsub.f32 %v835_v39, %v852_v61  ;;  %v347_v15 = vmul.f32 1.442695, %v346_v7  ;;  %v354_v23 = vsub.f32 %v839_v46, %v852_v61 }
  0x6b   :  { %v457_v20 = vpop.eup %456  ;;  %476 = vpow2.f32 %v303_v29  ;;  %v358_v32 = vsub.f32 %v842_v52, %v852_v61  ;;  %v362_v39 = vsub.f32 %v845_v58, %v852_v61  ;;  %v366_v46 = vsub.f32 %v848_v2, %v852_v61 }
  0x6c   :  { %v459_v21 = vpop.eup %458  ;;  %478 = vpow2.f32 %v307_v35  ;;  %v351_v17 = vmul.f32 1.442695, %v350_v14 }
  0x6d   :  { %v461_v26 = vpop.eup %460  ;;  %v269_v28 = vadd.f32 %v459_v21, %v457_v20  ;;  %480 = vpow2.f32 %v311_v40  ;;  %v355_v21 = vmul.f32 1.442695, %v354_v23  ;;  %v363_v29 = vmul.f32 1.442695, %v362_v39 }
  0x6e   :  { %v463_v63 = vpop.eup %462  ;;  %482 = vpow2.f32 %v315_v45 }
  0x6f   :  { %v273_v31 = vadd.f32 %v461_v26, %v269_v28  ;;  %v465_v33 = vpop.eup %464  ;;  %484 = vpow2.f32 %v319_v50  ;;  %v359_v26 = vmul.f32 1.442695, %v358_v32  ;;  %v373_v50 = vlaneseq }
  0x70   :  { %v467_v38 = vpop.eup %466  ;;  %486 = vpow2.f32 %v323_v56 }
  0x71   :  { %v277_v36 = vadd.f32 %v463_v63, %v273_v31  ;;  %v469_v43 = vpop.eup %468  ;;  %488 = vpow2.f32 %v327_v0  ;;  %v367_v31 = vmul.f32 1.442695, %v366_v46 }
  0x72   :  { %v471_v49 = vpop.eup %470  ;;  %490 = vpow2.f32 %v331_v4 }
  0x73   :  { %v281_v42 = vadd.f32 %v465_v33, %v277_v36  ;;  %v473_v54 = vpop.eup %472  ;;  %492 = vpow2.f32 %v335_v9 }
  0x74   :  { %v475_v60 = vpop.eup %474  ;;  %494 = vpow2.f32 %v339_v13 }
  0x75   :  { %v285_v47 = vadd.f32 %v467_v38, %v281_v42  ;;  %v477_v3 = vpop.eup %476  ;;  %496 = vpow2.f32 %v343_v25 }
  0x76   :  { %v479_v8 = vpop.eup %478  ;;  %498 = vpow2.f32 %v347_v15 }
  0x77   :  { %v289_v53 = vadd.f32 %v469_v43, %v285_v47  ;;  %v481_v11 = vpop.eup %480  ;;  %500 = vpow2.f32 %v351_v17 }
  0x78   :  { %v483_v22 = vpop.eup %482  ;;  %502 = vpow2.f32 %v355_v21 }
  0x79   :  { %v293_v59 = vadd.f32 %v471_v49, %v289_v53  ;;  %v485_v37 = vpop.eup %484  ;;  %504 = vpow2.f32 %v359_v26  ;;  %v374_v53 = vshrl.u32 %v373_v50, 7 }
  0x7a   :  { %v487_v44 = vpop.eup %486  ;;  %506 = vpow2.f32 %v363_v29 }
  0x7b   :  { %v297_v1 = vadd.f32 %v473_v54, %v293_v59  ;;  %v489_v20 = vpop.eup %488  ;;  %508 = vpow2.f32 %v367_v31  ;;  %v376_v54 = vand.u32 127, %v373_v50  ;;  %v380_v56 = vmul.u32 128, %v374_v53 }
  0x7c   :  { %v491_v57 = vpop.eup %490 }
  0x7d   :  { %v301_v5 = vadd.f32 %v475_v60, %v297_v1  ;;  %v493_v63 = vpop.eup %492  ;;  %v381_v41 = vadd.s32 %v380_v56, %v376_v54 }
  0x7e   :  { %v495_v52 = vpop.eup %494 }
  0x7f   :  { %v305_v10 = vadd.f32 %v477_v3, %v301_v5  ;;  %v497_v35 = vpop.eup %496  ;;  %vm382_vm0 = vcmp.lt.s32.totalorder %v381_v41, 1000 }
  0x80   :  { %v499_v58 = vpop.eup %498 }
  0x81   :  { %v309_v18 = vadd.f32 %v479_v8, %v305_v10  ;;  %v501_v38 = vpop.eup %500 }
  0x82   :  { %v503_v19 = vpop.eup %502 }
  0x83   :  { %v313_v30 = vadd.f32 %v481_v11, %v309_v18  ;;  %v505_v2 = vpop.eup %504 }
  0x84   :  { %v507_v45 = vpop.eup %506 }
  0x85   :  { %v317_v16 = vadd.f32 %v483_v22, %v313_v30  ;;  %v509_v47 = vpop.eup %508 }
  0x87   :  { %v321_v51 = vadd.f32 %v485_v37, %v317_v16 }
  0x89   :  { %v325_v24 = vadd.f32 %v487_v44, %v321_v51 }
  0x8b   :  { %v329_v28 = vadd.f32 %v489_v20, %v325_v24 }
  0x8d   :  { %v333_v6 = vadd.f32 %v491_v57, %v329_v28 }
  0x8f   :  { %v337_v33 = vadd.f32 %v493_v63, %v333_v6 }
  0x91   :  { %v341_v12 = vadd.f32 %v495_v52, %v337_v33 }
  0x93   :  { %v345_v36 = vadd.f32 %v497_v35, %v341_v12 }
  0x95   :  { %v349_v40 = vadd.f32 %v499_v58, %v345_v36 }
  0x97   :  { %v353_v42 = vadd.f32 %v501_v38, %v349_v40 }
  0x99   :  { %v357_v43 = vadd.f32 %v503_v19, %v353_v42 }
  0x9b   :  { %v361_v27 = vadd.f32 %v505_v2, %v357_v43 }
  0x9d   :  { %v365_v49 = vadd.f32 %v507_v45, %v361_v27 }
  0x9f   :  { %v369_v34 = vadd.f32 %v509_v47, %v365_v49 }
  0xa1   :  { %510 = vlog2.f32 %v369_v34 }
  0xab   :  { %v511_v59 = vpop.eup %510 }
  0xac   :  { %v371_v60 = vmul.f32 0.6931472, %v511_v59 }
  0xae   :  { %v372_v0 = vadd.f32 %v371_v60, %v852_v61 }
  0xb0   :  { %v383_v48 = vsel %vm382_vm0, %v372_v0, 0.0 }
  0xb1   :  { %384 = vst [vmem:[#allocation8] sm:$0xff] %v383_v48 }
  0xb2   :  { %547 = shalt.err (!%p544_p0)
}
  0xb3   :  { %s548_s26 = scalar_lea.hbm %s925_s4, 128 }
  0xb4   :  { %p549_p1 = scmp.ne.s32.totalorder %s925_s4, %s548_s26  ;;  %p552_p2 = scmp.lt.u32.totalorder %s548_s26, %s925_s4 }
  0xb6   :  { %p554_p3 = pnand %p552_p2, %p549_p1 }
  0xb8   :  { %557 = shalt.err (!%p554_p3)
}
  0xb9   :  { %394 = dma.vmem_to_hbm [thread:$0]  %s392_s0, 128, %s925_s4, [#allocation4]  }
  0xba   :  { %562 = dma.done.wait [#allocation4], 128  }
  0xbb   :  { %563 = vsyncadd [#allocation4], 4294967168 }
  0xbc   :  { %398 = vsyncpa [#allocation4], 1 }
  0xbd   :  { %399 = vsyncpa [#allocation5], 1 }
  0xbe   :  { %400 = vsyncpa [#allocation7], 1 }

</bundles_post_ra>
